<compile_context>
chip_gen: v7x
topology: tpu7x:2x2x1
jax: 0.10.0
libtpu: 0.0.40
codegen_flags: <defaults>
</compile_context>

<pallas_src>
import functools

import numpy as np
import jax
import jax.numpy as jnp
from jax.experimental import pallas as pl
from jax.experimental.pallas import tpu as pltpu


# ---------------------------------------------------------------------------
# small helpers
# ---------------------------------------------------------------------------
def _round_up(x, m):
    return ((x + m - 1) // m) * m


def _row_tile(m):
    """Largest row tile in {512,...,8} dividing m (m is a multiple of 8 by construction)."""
    for t in (512, 256, 128, 64, 32, 16, 8):
        if t <= m and m % t == 0:
            return t
    return m


def _col_tile(n):
    """Largest column tile in {1024,...,128} dividing n (n is a multiple of 128)."""
    for t in (1024, 512, 256, 128):
        if t <= n and n % t == 0:
            return t
    return n


# Loop-invariant blocks (weights / bias) do not need double buffering.  Probe
# once whether this jax build accepts pipeline_mode=pl.Buffered(1) and gives
# correct results with a changing block index; otherwise fall back silently.
_SINGLE_BUFFER_KWARGS = None


def _single_buffer_kwargs():
    global _SINGLE_BUFFER_KWARGS
    if _SINGLE_BUFFER_KWARGS is None:
        kwargs = {}
        try:
            mode = pl.Buffered(1)

            def _probe(x_ref, o_ref):
                o_ref[...] = x_ref[...] + 1.0

            x = jnp.arange(16 * 128, dtype=jnp.float32).reshape(16, 128)
            y = pl.pallas_call(
                _probe,
                out_shape=jax.ShapeDtypeStruct((16, 128), jnp.float32),
                grid=(2,),
                in_specs=[pl.BlockSpec((8, 128), lambda i: (i, 0),
                                       pipeline_mode=mode)],
                out_specs=pl.BlockSpec((8, 128), lambda i: (i, 0)),
            )(x)
            if bool(jnp.allclose(jax.block_until_ready(y), x + 1.0)):
                kwargs = {"pipeline_mode": mode}
        except Exception:
            kwargs = {}
        _SINGLE_BUFFER_KWARGS = kwargs
    return dict(_SINGLE_BUFFER_KWARGS)


# ---------------------------------------------------------------------------
# Projection kernels: one big MXU matmul producing the x-dependent part of the
# gates for BOTH directions (out width = 8*Hp), tiled over rows and columns.
# Output is emitted in bf16 (f32 accumulation in-register).
# ---------------------------------------------------------------------------
def _proj1_kernel(x_ref, w_ref, b_ref, o_ref):
    acc = jnp.dot(x_ref[...].astype(jnp.bfloat16), w_ref[...],
                  preferred_element_type=jnp.float32)
    o_ref[...] = (acc + b_ref[...]).astype(o_ref.dtype)


def _proj2_kernel(x2_ref, w2_ref, b_ref, o_ref):
    # Split matmul over the stacked (y_fwd, y_bwd) halves — no concat in HBM.
    acc = jnp.dot(x2_ref[0], w2_ref[0], preferred_element_type=jnp.float32)
    acc = acc + jnp.dot(x2_ref[1], w2_ref[1], preferred_element_type=jnp.float32)
    o_ref[...] = (acc + b_ref[...]).astype(o_ref.dtype)


def matmul_bias(x, w, b, *, out_dtype):
    """x: (M, K) any float; w: (K, N) bf16; b: (1, N) f32 -> (M, N) out_dtype."""
    M, K = x.shape
    N = w.shape[1]
    tm, tn = _row_tile(M), _col_tile(N)
    inv_kw = _single_buffer_kwargs()
    return pl.pallas_call(
        _proj1_kernel,
        out_shape=jax.ShapeDtypeStruct((M, N), out_dtype),
        grid_spec=pltpu.PrefetchScalarGridSpec(
            num_scalar_prefetch=0,
            # column axis outer so the weight block stays resident over the rows
            grid=(N // tn, M // tm),
            in_specs=[pl.BlockSpec((tm, K), lambda j, i: (i, 0)),
                      pl.BlockSpec((K, tn), lambda j, i: (0, j), **inv_kw),
                      pl.BlockSpec((1, tn), lambda j, i: (0, j), **inv_kw)],
            out_specs=pl.BlockSpec((tm, tn), lambda j, i: (i, j)),
        ),
        compiler_params=pltpu.CompilerParams(
            dimension_semantics=("parallel", "parallel")),
    )(x, w, b)


def matmul2_bias(x2, w2, b, *, out_dtype):
    """x2: (2, M, K) bf16; w2: (2, K, N) bf16; b: (1, N) f32 -> (M, N) out_dtype."""
    _, M, K = x2.shape
    N = w2.shape[2]
    tm, tn = _row_tile(M), _col_tile(N)
    inv_kw = _single_buffer_kwargs()
    return pl.pallas_call(
        _proj2_kernel,
        out_shape=jax.ShapeDtypeStruct((M, N), out_dtype),
        grid_spec=pltpu.PrefetchScalarGridSpec(
            num_scalar_prefetch=0,
            grid=(N // tn, M // tm),
            in_specs=[pl.BlockSpec((2, tm, K), lambda j, i: (0, i, 0)),
                      pl.BlockSpec((2, K, tn), lambda j, i: (0, 0, j), **inv_kw),
                      pl.BlockSpec((1, tn), lambda j, i: (0, j), **inv_kw)],
            out_specs=pl.BlockSpec((tm, tn), lambda j, i: (i, j)),
        ),
        compiler_params=pltpu.CompilerParams(
            dimension_semantics=("parallel", "parallel")),
    )(x2, w2, b)


# ---------------------------------------------------------------------------
# LSTM recurrence.  Grid = (direction, time-block): the direction axis is
# "parallel" (one TensorCore per direction on multi-TC chips), the time axis
# is "arbitrary" and carries h/c in VMEM scratch across grid steps.  Per step
# only h @ W_hh^T is computed — the input projection was hoisted.
# ---------------------------------------------------------------------------
def _lstm_dir_kernel(len_ref, gx_ref, whh_ref, y_ref, h_ref, c_ref, *,
                     tb, hp, carry_in_vregs, unroll):
    d = pl.program_id(0)           # 0 = forward, 1 = backward
    i = pl.program_id(1)           # time-block counter, in processing order
    nt = pl.num_programs(1)

    @pl.when(i == 0)
    def _():
        h_ref[...] = jnp.zeros_like(h_ref)
        c_ref[...] = jnp.zeros_like(c_ref)

    lengths = len_ref[...]         # (B, 1) int32 (constant block -> one DMA)
    w = whh_ref[...]               # (hp, 4hp) bf16, loop-invariant per direction
    B = h_ref.shape[0]
    is_fwd = d == 0
    # Real time block: i for fwd, nt-1-i for bwd (matches the index_maps).
    bi = i + d * (nt - 1 - 2 * i)
    base_t = bi * tb

    def one_step(s, h, c):
        # In-block position: fwd walks s = 0..tb-1, bwd walks tb-1..0.
        idx = jnp.where(is_fwd, s, tb - 1 - s)
        gates = gx_ref[idx].astype(jnp.float32) + jnp.dot(
            h.astype(jnp.bfloat16), w, preferred_element_type=jnp.float32)
        # Gate slices are 128-lane aligned because hp is a multiple of 128.
        # TODO(synk): on v6e/v7x the sigmoid/tanh passes could run in bf16
        # (keep c accumulation f32) to halve EUP/VPU work; kept f32 for v5e.
        ig = jax.nn.sigmoid(gates[:, 0 * hp:1 * hp])
        fg = jax.nn.sigmoid(gates[:, 1 * hp:2 * hp])
        gg = jnp.tanh(gates[:, 2 * hp:3 * hp])
        og = jax.nn.sigmoid(gates[:, 3 * hp:4 * hp])
        c_new = fg * c + ig * gg
        h_new = og * jnp.tanh(c_new)
        # Broadcast the validity mask once and reuse it in all three selects.
        valid = jnp.broadcast_to((base_t + idx) < lengths, (B, hp))
        y_ref[idx] = jnp.where(valid, h_new, 0.0).astype(y_ref.dtype)   # pad -> 0
        return jnp.where(valid, h_new, h), jnp.where(valid, c_new, c)   # freeze state

    if carry_in_vregs:
        # Keep h/c in vregs across the whole time block; touch scratch once.
        def step(s, carry):
            return one_step(s, *carry)
        h_fin, c_fin = jax.lax.fori_loop(
            0, tb, step, (h_ref[...], c_ref[...]), unroll=unroll)
        h_ref[...] = h_fin
        c_ref[...] = c_fin
    else:
        # Fallback for large B*Hp: per-step scratch read-modify-write.
        def step(s, carry):
            h_new, c_new = one_step(s, h_ref[...], c_ref[...])
            h_ref[...] = h_new
            c_ref[...] = c_new
            return carry
        jax.lax.fori_loop(0, tb, step, 0, unroll=unroll)


def run_bilstm_layer(gates_x, lengths2d, whh2, *, hp, tb):
    """gates_x: (Tp, B, 8*hp) bf16 (cols [0:4hp]=fwd, [4hp:8hp]=bwd);
    whh2: (2*hp, 4*hp) bf16 (rows [0:hp]=fwd, [hp:2hp]=bwd).
    Returns y: (2*Tp, B, hp) bf16 — first Tp time blocks = fwd, next Tp = bwd."""
    Tp, B, _ = gates_x.shape
    four_hp = 4 * hp
    nt = Tp // tb
    carry_in_vregs = (B * hp) <= 8192          # vreg-file gate (review guidance)
    unroll = min(tb, 8)                        # partial unroll keeps LLO visibility
    inv_kw = _single_buffer_kwargs()

    def tblk(d, i):
        # forward (d=0): block i ;  backward (d=1): block nt-1-i
        return i + d * (nt - 1 - 2 * i)

    kernel = functools.partial(_lstm_dir_kernel, tb=tb, hp=hp,
                               carry_in_vregs=carry_in_vregs, unroll=unroll)
    # TODO(synk): on v7x (64 MiB VMEM) set vmem_limit_bytes explicitly and/or
    # lower tb; also consider pl.Buffered(3) on the gx spec if DMA is exposed.
    return pl.pallas_call(
        kernel,
        out_shape=jax.ShapeDtypeStruct((2 * Tp, B, hp), jnp.bfloat16),
        grid_spec=pltpu.PrefetchScalarGridSpec(
            num_scalar_prefetch=0,
            grid=(2, nt),
            in_specs=[
                pl.BlockSpec((B, 1), lambda d, i: (0, 0)),                  # lengths
                pl.BlockSpec((tb, B, four_hp),
                             lambda d, i: (tblk(d, i), 0, d)),              # gx half
                pl.BlockSpec((hp, four_hp), lambda d, i: (d, 0), **inv_kw), # W_hh (single-buffered)
            ],
            out_specs=pl.BlockSpec((tb, B, hp),
                                   lambda d, i: (d * nt + tblk(d, i), 0, 0)),
            scratch_shapes=[pltpu.VMEM((B, hp), jnp.float32),   # h
                            pltpu.VMEM((B, hp), jnp.float32)],  # c
        ),
        compiler_params=pltpu.CompilerParams(
            dimension_semantics=("parallel", "arbitrary")),  # dir || , time carries state
    )(lengths2d, gates_x, whh2)


# ---------------------------------------------------------------------------
# Parameter preparation: PyTorch-layout weights -> padded, bf16 kernel layout.
# ---------------------------------------------------------------------------
def _pad_gate_cols(w, h, hp):
    """(..., 4h) -> (..., 4hp): zero-pad each of the i, f, g, o gate blocks."""
    lead = w.shape[:-1]
    w4 = w.reshape(lead + (4, h))
    w4 = jnp.pad(w4, [(0, 0)] * len(lead) + [(0, 0), (0, hp - h)])
    return w4.reshape(lead + (4 * hp,))


def _pad_rows(w, hp):
    return jnp.pad(w, ((0, hp - w.shape[0]), (0, 0)))


def prepare_params(raw, *, hidden, label_size, time_block=16):
    H = hidden
    Hp = _round_up(H, 128)
    Lp = _round_up(label_size, 128)

    layers = []
    for l, layer in enumerate(raw["layers"]):
        wih_f, whh_f, b_f = layer["fwd"]      # (in, 4H), (H, 4H), (4H,) [b = b_ih+b_hh]
        wih_b, whh_b, b_b = layer["bwd"]
        bias = jnp.concatenate(
            [_pad_gate_cols(b_f.reshape(1, -1), H, Hp),
             _pad_gate_cols(b_b.reshape(1, -1), H, Hp)], axis=1)        # (1, 8Hp) f32
        whh2 = jnp.concatenate(
            [_pad_rows(_pad_gate_cols(whh_f, H, Hp), Hp),
             _pad_rows(_pad_gate_cols(whh_b, H, Hp), Hp)],
            axis=0).astype(jnp.bfloat16)                                # (2Hp, 4Hp)
        entry = dict(bias=bias, whh2=whh2)
        if l == 0:
            entry["w_in"] = jnp.concatenate(
                [_pad_gate_cols(wih_f, H, Hp),
                 _pad_gate_cols(wih_b, H, Hp)], axis=1).astype(jnp.bfloat16)
        else:
            # rows [:H] of W_ih^T multiply y_fwd, rows [H:] multiply y_bwd
            top = jnp.concatenate(
                [_pad_rows(_pad_gate_cols(wih_f[:H], H, Hp), Hp),
                 _pad_rows(_pad_gate_cols(wih_b[:H], H, Hp), Hp)], axis=1)
            bot = jnp.concatenate(
                [_pad_rows(_pad_gate_cols(wih_f[H:], H, Hp), Hp),
                 _pad_rows(_pad_gate_cols(wih_b[H:], H, Hp), Hp)], axis=1)
            entry["w_in2"] = jnp.stack([top, bot]).astype(jnp.bfloat16)  # (2, Hp, 8Hp)
        layers.append(entry)

    L = label_size
    lin_w_t = raw["lin_w_t"]                  # (2H, L)
    pad_lin = lambda w: jnp.pad(w, ((0, Hp - w.shape[0]), (0, Lp - L)))
    lin_w2 = jnp.stack([pad_lin(lin_w_t[:H]),
                        pad_lin(lin_w_t[H:])]).astype(jnp.bfloat16)      # (2, Hp, Lp)
    return dict(
        embedding=raw["embedding"],
        layers=layers,
        lin_w2=lin_w2,
        lin_b=jnp.pad(raw["lin_b"].reshape(1, -1), ((0, 0), (0, Lp - L))),
        Hp=Hp, Lp=Lp, TB=time_block,
    )


# ---------------------------------------------------------------------------
# Full model forward.
# ---------------------------------------------------------------------------
def model_forward(tokens, lengths, params, *, label_size):
    Hp, Lp, TB = params["Hp"], params["Lp"], params["TB"]
    T, B = tokens.shape
    # Pad batch to a multiple of 8 (full MXU sublanes / state rows); padded
    # sequences get length 0 so they contribute exactly zero and are sliced off.
    Bp = _round_up(max(B, 8), 8)
    Tp = _round_up(T, TB)

    # Embedding lookup (dynamic gather) done as JAX glue.
    x = params["embedding"][tokens]                                   # (T, B, E)
    x = jnp.pad(x, ((0, Tp - T), (0, Bp - B), (0, 0)))                # (Tp, Bp, E)
    lengths_p = jnp.pad(lengths.astype(jnp.int32), (0, Bp - B))
    lengths2d = lengths_p.reshape(Bp, 1)
    M = Tp * Bp

    y2 = None
    for l, lp in enumerate(params["layers"]):
        # Hoisted input projection: one MXU matmul -> x-part of all gates, both dirs.
        # TODO(synk): could be fused into the recurrence kernel to skip the gx HBM
        # round trip (needs bf16 gx + single-buffered weights to fit v7x VMEM).
        if l == 0:
            gx = matmul_bias(x.reshape(M, x.shape[-1]), lp["w_in"], lp["bias"],
                             out_dtype=jnp.bfloat16)
        else:
            gx = matmul2_bias(y2, lp["w_in2"], lp["bias"], out_dtype=jnp.bfloat16)
        gx = gx.reshape(Tp, Bp, 8 * Hp)
        # Recurrence (only h @ W_hh per step); output stacked (fwd, bwd).
        y = run_bilstm_layer(gx, lengths2d, lp["whh2"], hp=Hp, tb=TB)
        y2 = y.reshape(2, M, Hp)                                      # free reshape

    # dropout(config.dropout_embed) in eval mode == identity.
    # Final linear runs per token on (T*B, .); the (B,T) reordering is folded
    # into the host-side masked_select (no device-side transpose).
    out = matmul2_bias(y2, params["lin_w2"], params["lin_b"], out_dtype=jnp.float32)
    return out.reshape(Tp, Bp, Lp)[:T, :B, :label_size]               # (T, B, L)


if __name__ == "__main__":
    # Small config consistent with the module.
    num_embeddings, embedding_dim = 64, 32
    hidden_size, num_layers, label_size = 32, 2, 8
    padding_idx = 0
    T, B = 16, 4
    lengths_np = np.array([16, 12, 9, 5], dtype=np.int32)  # descending (pack_padded)

    key = jax.random.PRNGKey(0)
    keys = list(jax.random.split(key, 32))
    ki = iter(keys)

    def u(k, shape, scale):
        return jax.random.uniform(k, shape, jnp.float32, -scale, scale)

    emb = jax.random.normal(next(ki), (num_embeddings, embedding_dim),
                            jnp.float32) * 0.1
    emb = emb.at[padding_idx].set(0.0)                  # nn.Embedding padding_idx row
    scale = 1.0 / float(np.sqrt(hidden_size))

    raw_layers = []
    in_dim = embedding_dim
    for _ in range(num_layers):
        layer = {}
        for d in ("fwd", "bwd"):
            wih_t = u(next(ki), (in_dim, 4 * hidden_size), scale)       # W_ih^T
            whh_t = u(next(ki), (hidden_size, 4 * hidden_size), scale)  # W_hh^T
            bias = u(next(ki), (4 * hidden_size,), scale)               # b_ih + b_hh
            layer[d] = (wih_t, whh_t, bias)
        raw_layers.append(layer)
        in_dim = 2 * hidden_size

    raw = dict(embedding=emb, layers=raw_layers,
               lin_w_t=u(next(ki), (2 * hidden_size, label_size), scale),
               lin_b=u(next(ki), (label_size,), scale))
    params = prepare_params(raw, hidden=hidden_size, label_size=label_size,
                            time_block=16)

    # Inputs: padded token ids (T, B), lengths (B,), mask (B, T).
    tok = jax.random.randint(next(ki), (T, B), 1, num_embeddings)
    valid_np = np.arange(T)[:, None] < lengths_np[None, :]            # (T, B)
    tokens = jnp.where(jnp.asarray(valid_np), tok, padding_idx).astype(jnp.int32)
    mask_bt = valid_np.T                                              # (B, T) bool
    lengths = jnp.asarray(lengths_np)

    result = model_forward(tokens, lengths, params, label_size=label_size)
    result = jax.block_until_ready(result)                            # (T, B, L)

    # torch.masked_select(result, mask.unsqueeze(2)).view(-1, L):
    # dynamic-shape select (and the (B,T) reordering) done on host.
    res_np = np.asarray(result).transpose(1, 0, 2).reshape(B * T, label_size)
    logit = res_np[mask_bt.reshape(-1)]
    assert logit.shape == (int(lengths_np.sum()), label_size)
    assert np.all(np.isfinite(logit))
    print("KERNEL_OK")
</pallas_src>

<mosaic_0001>
module attributes {stable_mosaic.version = 11 : i64} {
  func.func @_probe(%arg0: i32, %arg1: memref<8x128xf32, #tpu.memory_space<vmem>>, %arg2: memref<8x128xf32, #tpu.memory_space<vmem>>) attributes {dimension_semantics = [#tpu.dimension_semantics<arbitrary>], iteration_bounds = array<i64: 2>, scalar_prefetch = 0 : i64, scratch_operands = 0 : i64, tpu.core_type = #tpu.core_type<tc>, window_params = [{pipeline_mode = #tpu.pipeline_mode<synchronous>, transform_indices = @transform_0, window_bounds = array<i64: 8, 128>}, {transform_indices = @transform_1, window_bounds = array<i64: 8, 128>}]} {
    %c0 = arith.constant 0 : index
    %c0_0 = arith.constant 0 : index
    %0 = vector.load %arg1[%c0, %c0_0] : memref<8x128xf32, #tpu.memory_space<vmem>>, vector<8x128xf32>
    %cst = arith.constant 1.000000e+00 : f32
    %1 = vector.broadcast %cst : f32 to vector<8x128xf32>
    %2 = arith.addf %0, %1 : vector<8x128xf32>
    %c0_1 = arith.constant 0 : index
    %c0_2 = arith.constant 0 : index
    %3 = vector.load %arg2[%c0_1, %c0_2] : memref<8x128xf32, #tpu.memory_space<vmem>>, vector<8x128xf32>
    tpu.vector_store %arg2[%c0_1, %c0_2], %2 {strides = array<i32>} : memref<8x128xf32, #tpu.memory_space<vmem>>, vector<8x128xf32>,
    return
  }
  func.func @transform_0(%arg0: i32) -> (i32, i32) {
    %c0_i32 = arith.constant 0 : i32
    %c0_i32_0 = arith.constant 0 : i32
    return %arg0, %c0_i32 : i32, i32
  }
  func.func @transform_1(%arg0: i32) -> (i32, i32) {
    %c0_i32 = arith.constant 0 : i32
    %c0_i32_0 = arith.constant 0 : i32
    return %arg0, %c0_i32 : i32, i32
  }
}

module attributes {stable_mosaic.version = 11 : i64} {
  func.func @_proj1_kernel(%arg0: i32, %arg1: i32, %arg2: memref<128x32xf32, #tpu.memory_space<vmem>>, %arg3: memref<32x1024xbf16, #tpu.memory_space<vmem>>, %arg4: memref<1x1024xf32, #tpu.memory_space<vmem>>, %arg5: memref<128x1024xbf16, #tpu.memory_space<vmem>>) attributes {dimension_semantics = [#tpu.dimension_semantics<parallel>, #tpu.dimension_semantics<parallel>], iteration_bounds = array<i64: 1, 1>, scalar_prefetch = 0 : i64, scratch_operands = 0 : i64, tpu.core_type = #tpu.core_type<tc>, window_params = [{transform_indices = @transform_0, window_bounds = array<i64: 128, 32>}, {transform_indices = @transform_1, window_bounds = array<i64: 32, 1024>}, {transform_indices = @transform_2, window_bounds = array<i64: 1, 1024>}, {transform_indices = @transform_3, window_bounds = array<i64: 128, 1024>}]} {
    %c0 = arith.constant 0 : index
    %c0_0 = arith.constant 0 : index
    %0 = vector.load %arg2[%c0, %c0_0] : memref<128x32xf32, #tpu.memory_space<vmem>>, vector<128x32xf32>
    %1 = arith.truncf %0 : vector<128x32xf32> to vector<128x32xbf16>
    %c0_1 = arith.constant 0 : index
    %c0_2 = arith.constant 0 : index
    %2 = vector.load %arg3[%c0_1, %c0_2] : memref<32x1024xbf16, #tpu.memory_space<vmem>>, vector<32x1024xbf16>
    %cst = arith.constant dense<0.000000e+00> : vector<128x1024xf32>
    %3 = tpu.matmul %1, %2, %cst {dimension_numbers = #tpu.dot_dimension_numbers<[1], [0], [0], [1], [0, 0, 1, 1], [], []>} : vector<128x32xbf16>, vector<32x1024xbf16>, vector<128x1024xf32> -> vector<128x1024xf32>
    %c0_3 = arith.constant 0 : index
    %c0_4 = arith.constant 0 : index
    %4 = vector.load %arg4[%c0_3, %c0_4] : memref<1x1024xf32, #tpu.memory_space<vmem>>, vector<1x1024xf32>
    %5 = vector.broadcast %4 : vector<1x1024xf32> to vector<128x1024xf32>
    %6 = arith.addf %3, %5 : vector<128x1024xf32>
    %7 = arith.truncf %6 : vector<128x1024xf32> to vector<128x1024xbf16>
    %c0_5 = arith.constant 0 : index
    %c0_6 = arith.constant 0 : index
    %8 = vector.load %arg5[%c0_5, %c0_6] : memref<128x1024xbf16, #tpu.memory_space<vmem>>, vector<128x1024xbf16>
    tpu.vector_store %arg5[%c0_5, %c0_6], %7 {strides = array<i32>} : memref<128x1024xbf16, #tpu.memory_space<vmem>>, vector<128x1024xbf16>,
    return
  }
  func.func @transform_0(%arg0: i32, %arg1: i32) -> (i32, i32) {
    %c0_i32 = arith.constant 0 : i32
    %c0_i32_0 = arith.constant 0 : i32
    return %arg1, %c0_i32 : i32, i32
  }
  func.func @transform_1(%arg0: i32, %arg1: i32) -> (i32, i32) {
    %c0_i32 = arith.constant 0 : i32
    %c0_i32_0 = arith.constant 0 : i32
    return %c0_i32, %arg0 : i32, i32
  }
  func.func @transform_2(%arg0: i32, %arg1: i32) -> (i32, i32) {
    %c0_i32 = arith.constant 0 : i32
    %c0_i32_0 = arith.constant 0 : i32
    return %c0_i32, %arg0 : i32, i32
  }
  func.func @transform_3(%arg0: i32, %arg1: i32) -> (i32, i32) {
    %c0_i32 = arith.constant 0 : i32
    return %arg1, %arg0 : i32, i32
  }
}

</mosaic_0001>

<bundles_post_ra>
// kernel: tpu_custom_call.1
= control target key start
LH: loop header
LB: loop body
LE: loop exit
PB: predicated region body
PF: predicated region fallthrough
CT: control target
= control target key end

     0   :  { %6 = vsyncpa [#allocation3], 0  ;;  %s499_s0 = inlined_call_operand.hbm [shape: f32[16,128], index: 0, kind: input, shape index: {}]   ;;  %s500_s1 = inlined_call_operand.hbm [shape: f32[16,128], index: 1, kind: output, shape index: {}]  }
   0x1   :  { %7 = vsyncpa [#allocation4], 0 }
   0x2   :  { %9 = vsyncpa [#allocation4 + $0x1], 0  ;;  %s358_s6 = smov 0   ;;  %s360_s7 = smov 0  }
   0x3   :  { %s362_s8 = smov 0   ;;  %s364_s9 = smov 0  }
   0x4 LB: > { %s379_s10 = sadd.s32 4294967295, %s344_s9   ;;  %s193_s11 = sadd.s32 4294967294, %s344_s9   ;;  %s344_s9 = sphi %s364_s9, %s517_s9   ;;  %s340_s8 = sphi %s362_s8, %s516_s8   ;;  %s336_s7 = sphi %s360_s7, %s515_s7   ;;  %s332_s6 = sphi %s358_s6, %s514_s6  }
   0x5   : > { %s383_s12 = sadd.s32 1, %s344_s9   ;;  %s22_s13 = sadd.s32 1, %s340_s8 }
   0x6   : > { %s19_s14 = ssub.s32 %s344_s9, %s383_s12  ;;  %p35_p0 = scmp.ne.s32.totalorder %s336_s7, %s332_s6 }
   0x7   : > { %p20_p1 = scmp.eq.s32.totalorder %s19_s14, 0  ;;  %p36_p2 = scmp.eq.s32.totalorder %s379_s10, 0 }
   0x8   : > { %p58_p3 = scmp.ne.s32.totalorder %s340_s8, %s336_s7  ;;  %p59_p4 = scmp.eq.s32.totalorder %s379_s10, 1 }
   0x9   : > { %s395_s15 = scalar_select %p20_p1, %s340_s8, %s22_s13  }
   0xa   : > { %p397_p5 = por %p59_p4, %p58_p3  ;;  %p65_p6 = scmp.eq.s32.totalorder %s193_s11, 1 }
   0xb   : > { %p194_p7 = scmp.ge.s32.totalorder %s344_s9, 1  ;;  %p402_p8 = por %p36_p2, %p35_p0 }
   0xc   : > { %s505_s16 = scalar_select %p397_p5, 1, 0 }
   0xd   : > { %s506_s17 = scalar_select %p402_p8, 1, 0 }
   0xe   : > { %p72_p9 = scmp.lt.s32.totalorder %s344_s9, 3  ;;  %p407_p10 = por %p65_p6, %p35_p0 }
   0xf   : > { %s195_s19 = sshll.u32 %s379_s10, 7  ;;  %s346_s21 = smov [#allocation2]  }
  0x10   : > { %s507_s18 = scalar_select %p407_p10, 1, 0 }
  0x11   : > { %p412_p11 = pnand %p194_p7, %p72_p9  ;;  %s87_s22 = sshll.u32 %s346_s21, 4  ;;  %s88_s22 = int_to_ptr.vmem [resolvable:$true] %s87_s22 }
  0x12   : > { %s85_s25 = scalar_lea.hbm %s499_s0, %s195_s19  ;;  %s253_s30 = scalar_lea.hbm %s499_s0, 256 }
  0x13   : > { %s508_s20 = scalar_select %p412_p11, 1, 0 }
  0x14   : > { %p206_p12 = pneg %p412_p11  ;;  %s248_s27 = scalar_lea.hbm %s85_s25, 128 }
  0x15   : > { %p249_p0 = scmp.ne.s32.totalorder %s85_s25, %s248_s27  ;;  %p254_p4 = scmp.lt.u32.totalorder %s85_s25, %s499_s0 }
  0x16   : > { %p425_p13 = pnand %p206_p12, %p402_p8  ;;  %p255_p6 = scmp.lt.u32.totalorder %s253_s30, %s248_s27 }
  0x17   : > { %p257_p9 = scmp.lt.u32.totalorder %s248_s27, %s85_s25 }
  0x18   : > { %p250_p1 = pneg %p425_p13  ;;  %p256_p7 = por %p255_p6, %p254_p4 }
  0x1a   : > { %p251_p2 = pnand %p250_p1, %p249_p0  ;;  %p258_p12 = por %p257_p9, %p256_p7 }
  0x1c   : > { %p252_p3 = pneg %p251_p2 }
  0x1e   : > { %p259_p10 = pnand %p258_p12, %p252_p3 }
  0x20   : > { %262 = shalt.err (!%p259_p10)
}
  0x21   : > { %s263_s4 = scalar_lea.vmem %s88_s22, 128  ;;  %p271_p8 = scmp.lt.s32.totalorder %s88_s22, %s88_s22 }
  0x22   : > { %p264_p5 = scmp.ne.s32.totalorder %s88_s22, %s263_s4  ;;  %p272_p11 = scmp.lt.s32.totalorder %s263_s4, %s263_s4 }
  0x24   : > { %p266_p0 = pnand %p264_p5, %p250_p1  ;;  %p273_p4 = por %p272_p11, %p271_p8 }
  0x26   : > { %p267_p2 = pneg %p266_p0 }
  0x28   : > { %p274_p6 = pnand %p273_p4, %p267_p2 }
  0x2a   : > { %277 = shalt.err (!%p274_p6)
}
  0x2b   : > { %209 = dma.hbm_to_vmem [thread:$0]  (!%p425_p13), %s85_s25, 128, %s88_s22, [#allocation3]  }
  0x2c   : > { %p510_p7 = scmp.ne.s32.totalorder %s508_s20, 0 }
  0x2d   : > { %p511_p10 = scmp.ne.s32.totalorder (!%p510_p7), %s506_s17, 0 }
  0x2e   : > { %100 = sbr.rel (%p510_p7) target bundleno = 80 (0x50), region = 24 }
  0x35   : > { %323 = dma.done.wait (%p511_p10), [#allocation3], 128  }
  0x36   : > { %325 = vsyncadd (%p511_p10), [#allocation3], 4294967168  ;;  %s112_s5 = sand.u32 1, %s336_s7   ;;  %v115_v0 = vld [vmem:[#allocation2] sm:$0xff]  ;;  %s457_s20 = scalar_lea.hbm %s500_s1, %s195_s19 }
  0x37   : > { %s197_s11 = sshll.u32 %s112_s5, 3  ;;  %v116_v1 = vadd.f32 1.0, %v115_v0  ;;  %s119_s17 = scalar_lea.sflag [#allocation4], %s112_s5 }
  0x38   : > { %s114_s13 = scalar_lea.vmem [#allocation5], %s197_s11  ;;  %p512_p8 = scmp.ne.s32.totalorder %s505_s16, 0 }
  0x39   : > { %s132_s14 = sshll.u32 %s114_s13, 4  ;;  %117 = vst [vmem:[%s114_s13] sm:$0xff] %v116_v1  ;;  %s347_s24 = smov [#allocation5]   ;;  %s459_s14 = int_to_ptr.vmem [resolvable:$true] %s132_s14 }
  0x3a   : > { %s278_s23 = scalar_lea.vmem %s459_s14, 128  ;;  %s282_s10 = sshll.u32 %s347_s24, 4  ;;  %s283_s10 = int_to_ptr.vmem [resolvable:$false] %s282_s10 }
  0x3b   : > { %p279_p5 = scmp.ne.s32.totalorder %s459_s14, %s278_s23  ;;  %s284_s25 = scalar_lea.vmem %s283_s10, 256 }
  0x3c   : > { %p285_p1 = scmp.lt.s32.totalorder %s459_s14, %s283_s10  ;;  %p286_p3 = scmp.lt.s32.totalorder %s284_s25, %s278_s23 }
  0x3d   : > { %p280_p11 = pnand %p279_p5, %p512_p8 }
  0x3e   : > { %p287_p9 = por %p286_p3, %p285_p1 }
  0x3f   : > { %p281_p13 = pneg %p280_p11 }
  0x41   : > { %p288_p12 = pnand %p287_p9, %p281_p13 }
  0x43   : > { %291 = shalt.err (!%p288_p12)
}
  0x44   : > { %s292_s19 = scalar_lea.hbm %s457_s20, 128  ;;  %s296_s28 = scalar_lea.hbm %s500_s1, 256 }
  0x45   : > { %p293_p0 = scmp.ne.s32.totalorder %s457_s20, %s292_s19  ;;  %p297_p6 = scmp.lt.u32.totalorder %s457_s20, %s500_s1 }
  0x46   : > { %p298_p7 = scmp.lt.u32.totalorder %s296_s28, %s292_s19  ;;  %p300_p5 = scmp.lt.u32.totalorder %s292_s19, %s457_s20 }
  0x47   : > { %p294_p2 = pnand %p293_p0, %p512_p8 }
  0x48   : > { %p299_p10 = por %p298_p7, %p297_p6 }
  0x49   : > { %p295_p4 = pneg %p294_p2 }
  0x4a   : > { %p301_p11 = por %p300_p5, %p299_p10 }
  0x4c   : > { %p302_p13 = pnand %p301_p11, %p295_p4 }
  0x4e   : > { %305 = shalt.err (!%p302_p13)
}
  0x4f   : > { %204 = dma.vmem_to_hbm [thread:$0]  (%p512_p8), %s459_s14, 128, %s457_s20, %s119_s17  }
  0x50 PF: > { %p214_p1 = scmp.ge.s32.totalorder %s344_s9, 2  ;;  %s144_s2 = sand.u32 1, %s332_s6  }
  0x51   : > { %p513_p3 = scmp.ne.s32.totalorder %s507_s18, 0  ;;  %s145_s3 = scalar_lea.sflag [#allocation4], %s144_s2 }
  0x53   : > { %p211_p9 = pnand %p214_p1, %p513_p3 }
  0x55   : > { %327 = dma.done.wait (!%p211_p9), %s145_s3, 128  }
  0x56   : > { %329 = vsyncadd (!%p211_p9), %s145_s3, 4294967168  ;;  %p12_p12 = scmp.ge.s32.totalorder %s383_s12, 4   ;;  %s514_s6 = smov %s336_s7 }
  0x57   : > { %s515_s7 = smov %s340_s8  ;;  %s516_s8 = smov %s395_s15 }
  0x58   : > { %s517_s9 = smov %s383_s12  ;;  %14 = sbr.rel (!%p12_p12) target bundleno = 4 (0x4), region = 62 }
  0x5f   :  { %150 = vsyncpa [#allocation3], 1 }
  0x60   :  { %152 = vsyncpa [#allocation3 + $0x1], 1 }
  0x61   :  { %153 = vsyncpa [#allocation4], 1 }
  0x62   :  { %155 = vsyncpa [#allocation4 + $0x1], 1 }

// kernel: tpu_custom_call.1
= control target key start
LH: loop header
LB: loop body
LE: loop exit
PB: predicated region body
PF: predicated region fallthrough
CT: control target
= control target key end

     0   :  { %v1323_v8 = vmov 0   ;;  %vm178_vm0 = vcmask 261120   ;;  %s1692_s0 = inlined_call_operand.vmem [shape: f32[128,32], index: 0, kind: input, shape index: {}]   ;;  %s1693_s1 = inlined_call_operand.vmem [shape: bf16[32,1024], index: 1, kind: input, shape index: {}]   ;;  %s1694_s2 = inlined_call_operand.vmem [shape: f32[1,1024], index: 2, kind: input, shape index: {}]   ;;  %s1695_s3 = inlined_call_operand.hbm [shape: bf16[128,1024], index: 3, kind: output, shape index: {}]  }
   0x1   :  { %v40_v0 = vld [vmem:[%s1693_s1] sm:$0xff]  ;;  %v41_v2 = vld [vmem:[%s1693_s1 + $0x8] sm:$0xff]  ;;  %235 = vmatprep.mubr.bf16.mxu0 %v1323_v8  ;;  %348 = vmatprep.mubr.bf16.mxu1 %v1323_v8  ;;  %v42_v16 = vld [vmem:[%s1693_s1 + $0x10] sm:$0xff] }
   0x2   :  { %v44_v1 = vld [vmem:[%s1693_s1 + $0x20] sm:$0xff]  ;;  %v45_v4 = vld [vmem:[%s1693_s1 + $0x28] sm:$0xff]  ;;  %v46_v17 = vld [vmem:[%s1693_s1 + $0x30] sm:$0xff] }
   0x3   :  { %v1120_v3 = vcombine.high %v40_v0, %v44_v1  ;;  %v1119_v5 = vcombine.low %v40_v0, %v44_v1  ;;  %v48_v6 = vld [vmem:[%s1693_s1 + $0x40] sm:$0xff]  ;;  %v1122_v9 = vcombine.high %v41_v2, %v45_v4  ;;  %v1121_v10 = vcombine.low %v41_v2, %v45_v4  ;;  %v49_v12 = vld [vmem:[%s1693_s1 + $0x48] sm:$0xff]  ;;  %v43_v20 = vld [vmem:[%s1693_s1 + $0x18] sm:$0xff] }
   0x4   :  { %v52_v7 = vld [vmem:[%s1693_s1 + $0x60] sm:$0xff]  ;;  %v53_v13 = vld [vmem:[%s1693_s1 + $0x68] sm:$0xff]  ;;  %v47_v21 = vld [vmem:[%s1693_s1 + $0x38] sm:$0xff]  ;;  %v1124_v23 = vcombine.high %v42_v16, %v46_v17  ;;  %v1123_v28 = vcombine.low %v42_v16, %v46_v17 }
   0x5   :  { %v1128_v11 = vcombine.high %v48_v6, %v52_v7  ;;  %203 = vmatprep.subr.bf16.mxu0 %v1120_v3  ;;  %v1130_v14 = vcombine.high %v49_v12, %v53_v13  ;;  %v16_v15 = vld [vmem:[%s1692_s0] sm:$0xff]  ;;  %316 = vmatprep.subr.bf16.mxu1 %v1122_v9  ;;  %v1127_v18 = vcombine.low %v48_v6, %v52_v7  ;;  %v17_v19 = vld [vmem:[%s1692_s0 + $0x8] sm:$0xff]  ;;  %v50_v26 = vld [vmem:[%s1693_s1 + $0x50] sm:$0xff] }
   0x6   :  { %204 = vmatpush1.bf16.msra.mxu0 %v1119_v5  ;;  %317 = vmatpush1.bf16.msra.mxu1 %v1121_v10  ;;  %v1129_v22 = vcombine.low %v49_v12, %v53_v13  ;;  %v1126_v24 = vcombine.high %v43_v20, %v47_v21  ;;  %v1391_v25 = vpack.c.bf16 %v17_v19, %v16_v15  ;;  %v54_v27 = vld [vmem:[%s1693_s1 + $0x70] sm:$0xff]  ;;  %v51_v29 = vld [vmem:[%s1693_s1 + $0x58] sm:$0xff] }
   0x7   :  { %205 = vmatprep.subr.bf16.mxu0 %v1128_v11  ;;  %318 = vmatprep.subr.bf16.mxu1 %v1130_v14  ;;  %v55_v30 = vld [vmem:[%s1693_s1 + $0x78] sm:$0xff]  ;;  %v1125_v31 = vcombine.low %v43_v20, %v47_v21  ;;  %v1132_v32 = vcombine.high %v50_v26, %v54_v27 }
   0x8   :  { %v1134_v33 = vcombine.high %v51_v29, %v55_v30 }
   0xa   :  { %206 = vmatpush1.bf16.msra.mxu0 %v1127_v18  ;;  %319 = vmatpush1.bf16.msra.mxu1 %v1129_v22 }
   0xb   :  { %429 = vmatprep.subr.bf16.mxu0 %v1124_v23  ;;  %542 = vmatprep.subr.bf16.mxu1 %v1126_v24 }
   0xd   :  { %1135 = vmatmul.mubr.msk.bf16.vlgmr.msra.gmra.mrb[0].mxu0 %vm178_vm0, %v1391_v25 }
   0xe   :  { %8 = vsyncpa [#allocation3], 0  ;;  %1143 = vmatmul.mubr.msk.bf16.vlgmr.msra.gmra.mrb[0].mxu1 %vm178_vm0, %v1391_v25  ;;  %430 = vmatpush1.bf16.msra.mxu0 %v1123_v28  ;;  %v18_v34 = vld [vmem:[%s1692_s0 + $0x10] sm:$0xff]  ;;  %v19_v35 = vld [vmem:[%s1692_s0 + $0x18] sm:$0xff]  ;;  %v1131_v36 = vcombine.low %v50_v26, %v54_v27  ;;  %v1133_v37 = vcombine.low %v51_v29, %v55_v30  ;;  %v58_v57 = vlaneseq }
   0xf   :  { %543 = vmatpush1.bf16.msra.mxu1 %v1125_v31  ;;  %245 = vmatprep.mubr.bf16.mxu0 %v1323_v8  ;;  %v33_v38 = vpack.c.bf16 %v19_v35, %v18_v34  ;;  %v20_v39 = vld [vmem:[%s1692_s0 + $0x20] sm:$0xff]  ;;  %v21_v40 = vld [vmem:[%s1692_s0 + $0x28] sm:$0xff]  ;;  %v22_v42 = vld [vmem:[%s1692_s0 + $0x30] sm:$0xff] }
  0x10   :  { %358 = vmatprep.mubr.bf16.mxu1 %v1323_v8  ;;  %431 = vmatprep.subr.bf16.mxu0 %v1132_v32  ;;  %v34_v41 = vpack.c.bf16 %v21_v40, %v20_v39  ;;  %v23_v43 = vld [vmem:[%s1692_s0 + $0x38] sm:$0xff]  ;;  %v24_v45 = vld [vmem:[%s1692_s0 + $0x40] sm:$0xff]  ;;  %v25_v46 = vld [vmem:[%s1692_s0 + $0x48] sm:$0xff]  ;;  %v1513_v58 = vshrl.u32 %v58_v57, 7 }
  0x11   :  { %544 = vmatprep.subr.bf16.mxu1 %v1134_v33  ;;  %v35_v44 = vpack.c.bf16 %v23_v43, %v22_v42  ;;  %v36_v47 = vpack.c.bf16 %v25_v46, %v24_v45  ;;  %v26_v48 = vld [vmem:[%s1692_s0 + $0x50] sm:$0xff]  ;;  %v27_v49 = vld [vmem:[%s1692_s0 + $0x58] sm:$0xff]  ;;  %v28_v51 = vld [vmem:[%s1692_s0 + $0x60] sm:$0xff] }
  0x12   :  { %432 = vmatpush1.bf16.msra.mxu0 %v1131_v36  ;;  %v37_v50 = vpack.c.bf16 %v27_v49, %v26_v48  ;;  %v29_v52 = vld [vmem:[%s1692_s0 + $0x68] sm:$0xff]  ;;  %v30_v54 = vld [vmem:[%s1692_s0 + $0x70] sm:$0xff]  ;;  %v31_v55 = vld [vmem:[%s1692_s0 + $0x78] sm:$0xff]  ;;  %v60_v59 = vsub.s32 0, %v1513_v58  ;;  %v68_v61 = vsub.s32 2, %v1513_v58  ;;  %v64_v62 = vsub.s32 1, %v1513_v58 }
  0x13   :  { %545 = vmatpush1.bf16.msra.mxu1 %v1133_v37  ;;  %v38_v53 = vpack.c.bf16 %v29_v52, %v28_v51  ;;  %v39_v56 = vpack.c.bf16 %v31_v55, %v30_v54  ;;  %v1519_v60 = vld [vmem:[%s1694_s2] sm:$0xff]  ;;  %v72_v63 = vsub.s32 3, %v1513_v58  ;;  %s1324_s2 = smov [#allocation2]  }
  0x14   :  { %v1525_v0 = vrot.slane %v1519_v60, %v60_v59  ;;  %v1528_v1 = vrot.slane %v1519_v60, %v68_v61  ;;  %v1531_v2 = vrot.slane %v1519_v60, %v64_v62  ;;  %s1108_s22 = sshll.u32 %s1324_s2, 4  ;;  %s1109_s22 = int_to_ptr.vmem [resolvable:$true] %s1108_s22 }
  0x15   :  { %1136 = vmatmul.mubr.msk.bf16.gmra.mrb[4].mxu0 %vm178_vm0, %v33_v38  ;;  %v1534_v3 = vrot.slane %v1519_v60, %v72_v63  ;;  %s1299_s23 = scalar_lea.vmem %s1109_s22, 8192  ;;  %p1304_p1 = scmp.lt.s32.totalorder %s1109_s22, %s1109_s22 }
  0x16   :  { %1144 = vmatmul.mubr.msk.bf16.gmra.mrb[4].mxu1 %vm178_vm0, %v33_v38  ;;  %255 = vmatprep.mubr.bf16.mxu0 %v1323_v8  ;;  %p1300_p0 = scmp.ne.s32.totalorder %s1109_s22, %s1299_s23  ;;  %p1305_p2 = scmp.lt.s32.totalorder %s1299_s23, %s1299_s23 }
  0x17   :  { %368 = vmatprep.mubr.bf16.mxu1 %v1323_v8 }
  0x18   :  { %p1306_p3 = por %p1305_p2, %p1304_p1 }
  0x1a   :  { %p1307_p4 = pnand %p1306_p3, %p1300_p0 }
  0x1d   :  { %1137 = vmatmul.mubr.msk.bf16.gmra.mrb[8].mxu0 %vm178_vm0, %v34_v41 }
  0x1e   :  { %1145 = vmatmul.mubr.msk.bf16.gmra.mrb[8].mxu1 %vm178_vm0, %v34_v41  ;;  %265 = vmatprep.mubr.bf16.mxu0 %v1323_v8 }
  0x1f   :  { %378 = vmatprep.mubr.bf16.mxu1 %v1323_v8 }
  0x25   :  { %1138 = vmatmul.mubr.msk.bf16.gmra.mrb[12].mxu0 %vm178_vm0, %v35_v44 }
  0x26   :  { %1146 = vmatmul.mubr.msk.bf16.gmra.mrb[12].mxu1 %vm178_vm0, %v35_v44  ;;  %275 = vmatprep.mubr.bf16.mxu0 %v1323_v8 }
  0x27   :  { %388 = vmatprep.mubr.bf16.mxu1 %v1323_v8 }
  0x2d   :  { %1139 = vmatmul.mubr.msk.bf16.gmra.mrb[16].mxu0 %vm178_vm0, %v36_v47 }
  0x2e   :  { %1147 = vmatmul.mubr.msk.bf16.gmra.mrb[16].mxu1 %vm178_vm0, %v36_v47  ;;  %285 = vmatprep.mubr.bf16.mxu0 %v1323_v8 }
  0x2f   :  { %398 = vmatprep.mubr.bf16.mxu1 %v1323_v8 }
  0x35   :  { %1140 = vmatmul.mubr.msk.bf16.gmra.mrb[20].mxu0 %vm178_vm0, %v37_v50 }
  0x36   :  { %1148 = vmatmul.mubr.msk.bf16.gmra.mrb[20].mxu1 %vm178_vm0, %v37_v50  ;;  %295 = vmatprep.mubr.bf16.mxu0 %v1323_v8 }
  0x37   :  { %408 = vmatprep.mubr.bf16.mxu1 %v1323_v8 }
  0x3d   :  { %1141 = vmatmul.mubr.msk.bf16.gmra.mrb[24].mxu0 %vm178_vm0, %v38_v53 }
  0x3e   :  { %1149 = vmatmul.mubr.msk.bf16.gmra.mrb[24].mxu1 %vm178_vm0, %v38_v53  ;;  %305 = vmatprep.mubr.bf16.mxu0 %v1323_v8 }
  0x3f   :  { %418 = vmatprep.mubr.bf16.mxu1 %v1323_v8 }
  0x45   :  { %1142 = vmatmul.mubr.msk.bf16.gmra.mrb[28].mxu0 %vm178_vm0, %v39_v56 }
  0x46   :  { %1150 = vmatmul.mubr.msk.bf16.gmra.mrb[28].mxu1 %vm178_vm0, %v39_v56  ;;  %461 = vmatprep.mubr.bf16.mxu0 %v1323_v8 }
  0x47   :  { %574 = vmatprep.mubr.bf16.mxu1 %v1323_v8 }
  0x4d   :  { %1151 = vmatmul.mubr.msk.bf16.vlgmr.msra.gmra.mrb[32].mxu0 %vm178_vm0, %v1391_v25 }
  0x4e   :  { %1159 = vmatmul.mubr.msk.bf16.vlgmr.msra.gmra.mrb[32].mxu1 %vm178_vm0, %v1391_v25  ;;  %471 = vmatprep.mubr.bf16.mxu0 %v1323_v8 }
  0x4f   :  { %584 = vmatprep.mubr.bf16.mxu1 %v1323_v8 }
  0x55   :  { %1152 = vmatmul.mubr.msk.bf16.gmra.mrb[36].mxu0 %vm178_vm0, %v33_v38 }
  0x56   :  { %1160 = vmatmul.mubr.msk.bf16.gmra.mrb[36].mxu1 %vm178_vm0, %v33_v38  ;;  %481 = vmatprep.mubr.bf16.mxu0 %v1323_v8 }
  0x57   :  { %594 = vmatprep.mubr.bf16.mxu1 %v1323_v8 }
  0x5d   :  { %1153 = vmatmul.mubr.msk.bf16.gmra.mrb[40].mxu0 %vm178_vm0, %v34_v41 }
  0x5e   :  { %1161 = vmatmul.mubr.msk.bf16.gmra.mrb[40].mxu1 %vm178_vm0, %v34_v41  ;;  %491 = vmatprep.mubr.bf16.mxu0 %v1323_v8 }
  0x5f   :  { %604 = vmatprep.mubr.bf16.mxu1 %v1323_v8 }
  0x65   :  { %1154 = vmatmul.mubr.msk.bf16.gmra.mrb[44].mxu0 %vm178_vm0, %v35_v44 }
  0x66   :  { %1162 = vmatmul.mubr.msk.bf16.gmra.mrb[44].mxu1 %vm178_vm0, %v35_v44  ;;  %501 = vmatprep.mubr.bf16.mxu0 %v1323_v8 }
  0x67   :  { %614 = vmatprep.mubr.bf16.mxu1 %v1323_v8 }
  0x6d   :  { %1155 = vmatmul.mubr.msk.bf16.gmra.mrb[48].mxu0 %vm178_vm0, %v36_v47 }
  0x6e   :  { %1163 = vmatmul.mubr.msk.bf16.gmra.mrb[48].mxu1 %vm178_vm0, %v36_v47  ;;  %511 = vmatprep.mubr.bf16.mxu0 %v1323_v8 }
  0x6f   :  { %624 = vmatprep.mubr.bf16.mxu1 %v1323_v8 }
  0x75   :  { %1156 = vmatmul.mubr.msk.bf16.gmra.mrb[52].mxu0 %vm178_vm0, %v37_v50 }
  0x76   :  { %1164 = vmatmul.mubr.msk.bf16.gmra.mrb[52].mxu1 %vm178_vm0, %v37_v50  ;;  %521 = vmatprep.mubr.bf16.mxu0 %v1323_v8 }
  0x77   :  { %634 = vmatprep.mubr.bf16.mxu1 %v1323_v8 }
  0x7d   :  { %1157 = vmatmul.mubr.msk.bf16.gmra.mrb[56].mxu0 %vm178_vm0, %v38_v53 }
  0x7e   :  { %1165 = vmatmul.mubr.msk.bf16.gmra.mrb[56].mxu1 %vm178_vm0, %v38_v53  ;;  %531 = vmatprep.mubr.bf16.mxu0 %v1323_v8 }
  0x7f   :  { %644 = vmatprep.mubr.bf16.mxu1 %v1323_v8 }
  0x85   :  { %1158 = vmatmul.mubr.msk.bf16.gmra.mrb[60].mxu0 %vm178_vm0, %v39_v56 }
  0x86   :  { %1166 = vmatmul.mubr.msk.bf16.gmra.mrb[60].mxu1 %vm178_vm0, %v39_v56 }
  0xe0   :  { %v237_v4 = vpop.f32.mrb[0].mxu0 }
  0xe1   :  { %v238_v5 = vadd.f32 %v237_v4, %v1525_v0  ;;  %v350_v6 = vpop.f32.mrb[0].mxu1  ;;  %v239_v7 = vpop.f32.mrb[1].mxu0 }
  0xe2   :  { %v351_v8 = vadd.f32 %v350_v6, %v1528_v1  ;;  %v240_v9 = vadd.f32 %v239_v7, %v1531_v2  ;;  %v352_v10 = vpop.f32.mrb[1].mxu1  ;;  %v241_v11 = vpop.f32.mrb[2].mxu0 }
  0xe3   :  { %v353_v12 = vadd.f32 %v352_v10, %v1534_v3  ;;  %v242_v13 = vadd.f32 %v241_v11, %v1525_v0  ;;  %v354_v14 = vpop.f32.mrb[2].mxu1  ;;  %v243_v15 = vpop.f32.mrb[3].mxu0 }
  0xe4   :  { %v1231_v16 = vpack.c.bf16 %v240_v9, %v238_v5  ;;  %v355_v17 = vadd.f32 %v354_v14, %v1528_v1  ;;  %v244_v18 = vadd.f32 %v243_v15, %v1531_v2  ;;  %v356_v19 = vpop.f32.mrb[3].mxu1 }
  0xe5   :  { %v1232_v20 = vpack.c.bf16 %v353_v12, %v351_v8  ;;  %v357_v21 = vadd.f32 %v356_v19, %v1534_v3 }
  0xe6   :  { %1039 = vst [vmem:[#allocation2] sm:$0xff] %v1231_v16  ;;  %v1235_v22 = vpack.c.bf16 %v244_v18, %v242_v13 }
  0xe7   :  { %1040 = vst [vmem:[#allocation2 + $0x8] sm:$0xff] %v1232_v20  ;;  %v1236_v23 = vpack.c.bf16 %v357_v21, %v355_v17 }
  0xe8   :  { %1043 = vst [vmem:[#allocation2 + $0x20] sm:$0xff] %v1235_v22  ;;  %v247_v24 = vpop.f32.mrb[4].mxu0 }
  0xe9   :  { %1044 = vst [vmem:[#allocation2 + $0x28] sm:$0xff] %v1236_v23  ;;  %v248_v25 = vadd.f32 %v247_v24, %v1525_v0  ;;  %v360_v26 = vpop.f32.mrb[4].mxu1  ;;  %v249_v27 = vpop.f32.mrb[5].mxu0 }
  0xea   :  { %v361_v28 = vadd.f32 %v360_v26, %v1528_v1  ;;  %v250_v29 = vadd.f32 %v249_v27, %v1531_v2  ;;  %v362_v30 = vpop.f32.mrb[5].mxu1  ;;  %v251_v31 = vpop.f32.mrb[6].mxu0 }
  0xeb   :  { %v363_v32 = vadd.f32 %v362_v30, %v1534_v3  ;;  %v252_v33 = vadd.f32 %v251_v31, %v1525_v0  ;;  %v364_v34 = vpop.f32.mrb[6].mxu1  ;;  %v253_v35 = vpop.f32.mrb[7].mxu0 }
  0xec   :  { %v1239_v36 = vpack.c.bf16 %v250_v29, %v248_v25  ;;  %v365_v37 = vadd.f32 %v364_v34, %v1528_v1  ;;  %v254_v38 = vadd.f32 %v253_v35, %v1531_v2  ;;  %v366_v39 = vpop.f32.mrb[7].mxu1 }
  0xed   :  { %v1240_v40 = vpack.c.bf16 %v363_v32, %v361_v28  ;;  %v367_v41 = vadd.f32 %v366_v39, %v1534_v3 }
  0xee   :  { %1047 = vst [vmem:[#allocation2 + $0x40] sm:$0xff] %v1239_v36  ;;  %v1243_v42 = vpack.c.bf16 %v254_v38, %v252_v33 }
  0xef   :  { %1048 = vst [vmem:[#allocation2 + $0x48] sm:$0xff] %v1240_v40  ;;  %v1244_v43 = vpack.c.bf16 %v367_v41, %v365_v37 }
  0xf0   :  { %1051 = vst [vmem:[#allocation2 + $0x60] sm:$0xff] %v1243_v42  ;;  %v257_v44 = vpop.f32.mrb[8].mxu0 }
  0xf1   :  { %1052 = vst [vmem:[#allocation2 + $0x68] sm:$0xff] %v1244_v43  ;;  %v258_v45 = vadd.f32 %v257_v44, %v1525_v0  ;;  %v370_v46 = vpop.f32.mrb[8].mxu1  ;;  %v259_v47 = vpop.f32.mrb[9].mxu0 }
  0xf2   :  { %v371_v48 = vadd.f32 %v370_v46, %v1528_v1  ;;  %v260_v49 = vadd.f32 %v259_v47, %v1531_v2  ;;  %v372_v50 = vpop.f32.mrb[9].mxu1  ;;  %v261_v51 = vpop.f32.mrb[10].mxu0 }
  0xf3   :  { %v373_v52 = vadd.f32 %v372_v50, %v1534_v3  ;;  %v262_v53 = vadd.f32 %v261_v51, %v1525_v0  ;;  %v374_v54 = vpop.f32.mrb[10].mxu1  ;;  %v263_v55 = vpop.f32.mrb[11].mxu0 }
  0xf4   :  { %v1247_v56 = vpack.c.bf16 %v260_v49, %v258_v45  ;;  %v375_v57 = vadd.f32 %v374_v54, %v1528_v1  ;;  %v264_v59 = vadd.f32 %v263_v55, %v1531_v2  ;;  %v376_v61 = vpop.f32.mrb[11].mxu1 }
  0xf5   :  { %v1248_v62 = vpack.c.bf16 %v373_v52, %v371_v48  ;;  %v377_v63 = vadd.f32 %v376_v61, %v1534_v3 }
  0xf6   :  { %1055 = vst [vmem:[#allocation2 + $0x80] sm:$0xff] %v1247_v56  ;;  %v1251_v4 = vpack.c.bf16 %v264_v59, %v262_v53 }
  0xf7   :  { %1056 = vst [vmem:[#allocation2 + $0x88] sm:$0xff] %v1248_v62  ;;  %v1252_v5 = vpack.c.bf16 %v377_v63, %v375_v57 }
  0xf8   :  { %1059 = vst [vmem:[#allocation2 + $0xa0] sm:$0xff] %v1251_v4  ;;  %v267_v6 = vpop.f32.mrb[12].mxu0 }
  0xf9   :  { %1060 = vst [vmem:[#allocation2 + $0xa8] sm:$0xff] %v1252_v5  ;;  %v268_v7 = vadd.f32 %v267_v6, %v1525_v0  ;;  %v380_v8 = vpop.f32.mrb[12].mxu1  ;;  %v269_v9 = vpop.f32.mrb[13].mxu0 }
  0xfa   :  { %v381_v10 = vadd.f32 %v380_v8, %v1528_v1  ;;  %v270_v11 = vadd.f32 %v269_v9, %v1531_v2  ;;  %v382_v12 = vpop.f32.mrb[13].mxu1  ;;  %v271_v13 = vpop.f32.mrb[14].mxu0 }
  0xfb   :  { %v383_v14 = vadd.f32 %v382_v12, %v1534_v3  ;;  %v272_v15 = vadd.f32 %v271_v13, %v1525_v0  ;;  %v384_v16 = vpop.f32.mrb[14].mxu1  ;;  %v273_v17 = vpop.f32.mrb[15].mxu0 }
  0xfc   :  { %v1255_v18 = vpack.c.bf16 %v270_v11, %v268_v7  ;;  %v385_v19 = vadd.f32 %v384_v16, %v1528_v1  ;;  %v274_v20 = vadd.f32 %v273_v17, %v1531_v2  ;;  %v386_v21 = vpop.f32.mrb[15].mxu1 }
  0xfd   :  { %v1256_v22 = vpack.c.bf16 %v383_v14, %v381_v10  ;;  %v387_v23 = vadd.f32 %v386_v21, %v1534_v3 }
  0xfe   :  { %1063 = vst [vmem:[#allocation2 + $0xc0] sm:$0xff] %v1255_v18  ;;  %v1259_v24 = vpack.c.bf16 %v274_v20, %v272_v15 }
  0xff   :  { %1064 = vst [vmem:[#allocation2 + $0xc8] sm:$0xff] %v1256_v22  ;;  %v1260_v25 = vpack.c.bf16 %v387_v23, %v385_v19 }
 0x100   :  { %1067 = vst [vmem:[#allocation2 + $0xe0] sm:$0xff] %v1259_v24  ;;  %v277_v26 = vpop.f32.mrb[16].mxu0 }
 0x101   :  { %1068 = vst [vmem:[#allocation2 + $0xe8] sm:$0xff] %v1260_v25  ;;  %v278_v27 = vadd.f32 %v277_v26, %v1525_v0  ;;  %v390_v28 = vpop.f32.mrb[16].mxu1  ;;  %v279_v29 = vpop.f32.mrb[17].mxu0 }
 0x102   :  { %v391_v30 = vadd.f32 %v390_v28, %v1528_v1  ;;  %v280_v31 = vadd.f32 %v279_v29, %v1531_v2  ;;  %v392_v32 = vpop.f32.mrb[17].mxu1  ;;  %v281_v33 = vpop.f32.mrb[18].mxu0 }
 0x103   :  { %v393_v34 = vadd.f32 %v392_v32, %v1534_v3  ;;  %v282_v35 = vadd.f32 %v281_v33, %v1525_v0  ;;  %v394_v36 = vpop.f32.mrb[18].mxu1  ;;  %v283_v37 = vpop.f32.mrb[19].mxu0  ;;  %v76_v32 = vsub.s32 4, %v1513_v58 }
 0x104   :  { %v1263_v38 = vpack.c.bf16 %v280_v31, %v278_v27  ;;  %v395_v39 = vadd.f32 %v394_v36, %v1528_v1  ;;  %v284_v40 = vadd.f32 %v283_v37, %v1531_v2  ;;  %v396_v41 = vpop.f32.mrb[19].mxu1  ;;  %v84_v37 = vsub.s32 6, %v1513_v58 }
 0x105   :  { %v1264_v42 = vpack.c.bf16 %v393_v34, %v391_v30  ;;  %v397_v43 = vadd.f32 %v396_v41, %v1534_v3 }
 0x106   :  { %1071 = vst [vmem:[#allocation2 + $0x100] sm:$0xff] %v1263_v38  ;;  %v1267_v44 = vpack.c.bf16 %v284_v40, %v282_v35  ;;  %v80_v38 = vsub.s32 5, %v1513_v58 }
 0x107   :  { %1072 = vst [vmem:[#allocation2 + $0x108] sm:$0xff] %v1264_v42  ;;  %v1268_v45 = vpack.c.bf16 %v397_v43, %v395_v39  ;;  %v88_v43 = vsub.s32 7, %v1513_v58 }
 0x108   :  { %1075 = vst [vmem:[#allocation2 + $0x120] sm:$0xff] %v1267_v44  ;;  %v287_v46 = vpop.f32.mrb[20].mxu0 }
 0x109   :  { %1076 = vst [vmem:[#allocation2 + $0x128] sm:$0xff] %v1268_v45  ;;  %v288_v47 = vadd.f32 %v287_v46, %v1525_v0  ;;  %v400_v48 = vpop.f32.mrb[20].mxu1  ;;  %v289_v49 = vpop.f32.mrb[21].mxu0 }
 0x10a   :  { %v401_v50 = vadd.f32 %v400_v48, %v1528_v1  ;;  %v290_v51 = vadd.f32 %v289_v49, %v1531_v2  ;;  %v402_v52 = vpop.f32.mrb[21].mxu1  ;;  %v291_v53 = vpop.f32.mrb[22].mxu0 }
 0x10b   :  { %v403_v54 = vadd.f32 %v402_v52, %v1534_v3  ;;  %v292_v55 = vadd.f32 %v291_v53, %v1525_v0  ;;  %v404_v56 = vpop.f32.mrb[22].mxu1  ;;  %v293_v57 = vpop.f32.mrb[23].mxu0  ;;  %v1611_v52 = vrot.slane %v1519_v60, %v80_v38 }
 0x10c   :  { %v1271_v59 = vpack.c.bf16 %v290_v51, %v288_v47  ;;  %v405_v61 = vadd.f32 %v404_v56, %v1528_v1  ;;  %v294_v62 = vadd.f32 %v293_v57, %v1531_v2  ;;  %v406_v63 = vpop.f32.mrb[23].mxu1 }
 0x10d   :  { %v1272_v4 = vpack.c.bf16 %v403_v54, %v401_v50  ;;  %v407_v5 = vadd.f32 %v406_v63, %v1534_v3  ;;  %v1605_v50 = vrot.slane %v1519_v60, %v76_v32 }
 0x10e   :  { %1079 = vst [vmem:[#allocation2 + $0x140] sm:$0xff] %v1271_v59  ;;  %v1275_v6 = vpack.c.bf16 %v294_v62, %v292_v55 }
 0x10f   :  { %1080 = vst [vmem:[#allocation2 + $0x148] sm:$0xff] %v1272_v4  ;;  %v1276_v7 = vpack.c.bf16 %v407_v5, %v405_v61 }
 0x110   :  { %1083 = vst [vmem:[#allocation2 + $0x160] sm:$0xff] %v1275_v6  ;;  %v297_v8 = vpop.f32.mrb[24].mxu0 }
 0x111   :  { %1084 = vst [vmem:[#allocation2 + $0x168] sm:$0xff] %v1276_v7  ;;  %v298_v9 = vadd.f32 %v297_v8, %v1525_v0  ;;  %v410_v10 = vpop.f32.mrb[24].mxu1  ;;  %v299_v11 = vpop.f32.mrb[25].mxu0 }
 0x112   :  { %v411_v12 = vadd.f32 %v410_v10, %v1528_v1  ;;  %v300_v13 = vadd.f32 %v299_v11, %v1531_v2  ;;  %v412_v14 = vpop.f32.mrb[25].mxu1  ;;  %v301_v15 = vpop.f32.mrb[26].mxu0 }
 0x113   :  { %v413_v16 = vadd.f32 %v412_v14, %v1534_v3  ;;  %v302_v17 = vadd.f32 %v301_v15, %v1525_v0  ;;  %v414_v18 = vpop.f32.mrb[26].mxu1  ;;  %v303_v19 = vpop.f32.mrb[27].mxu0 }
 0x114   :  { %v1279_v20 = vpack.c.bf16 %v300_v13, %v298_v9  ;;  %v415_v21 = vadd.f32 %v414_v18, %v1528_v1  ;;  %v304_v22 = vadd.f32 %v303_v19, %v1531_v2  ;;  %v416_v23 = vpop.f32.mrb[27].mxu1 }
 0x115   :  { %v1280_v24 = vpack.c.bf16 %v413_v16, %v411_v12  ;;  %v417_v25 = vadd.f32 %v416_v23, %v1534_v3 }
 0x116   :  { %1087 = vst [vmem:[#allocation2 + $0x180] sm:$0xff] %v1279_v20  ;;  %v1283_v26 = vpack.c.bf16 %v304_v22, %v302_v17 }
 0x117   :  { %1088 = vst [vmem:[#allocation2 + $0x188] sm:$0xff] %v1280_v24  ;;  %v1284_v27 = vpack.c.bf16 %v417_v25, %v415_v21 }
 0x118   :  { %1091 = vst [vmem:[#allocation2 + $0x1a0] sm:$0xff] %v1283_v26  ;;  %v307_v28 = vpop.f32.mrb[28].mxu0 }
 0x119   :  { %1092 = vst [vmem:[#allocation2 + $0x1a8] sm:$0xff] %v1284_v27  ;;  %v308_v29 = vadd.f32 %v307_v28, %v1525_v0  ;;  %v420_v30 = vpop.f32.mrb[28].mxu1  ;;  %v309_v31 = vpop.f32.mrb[29].mxu0 }
 0x11a   :  { %v421_v33 = vadd.f32 %v420_v30, %v1528_v1  ;;  %v310_v34 = vadd.f32 %v309_v31, %v1531_v2  ;;  %v422_v35 = vpop.f32.mrb[29].mxu1  ;;  %v311_v36 = vpop.f32.mrb[30].mxu0 }
 0x11b   :  { %v423_v39 = vadd.f32 %v422_v35, %v1534_v3  ;;  %v312_v40 = vadd.f32 %v311_v36, %v1525_v0  ;;  %v424_v41 = vpop.f32.mrb[30].mxu1  ;;  %v313_v42 = vpop.f32.mrb[31].mxu0  ;;  %v1608_v0 = vrot.slane %v1519_v60, %v84_v37 }
 0x11c   :  { %v1287_v44 = vpack.c.bf16 %v310_v34, %v308_v29  ;;  %v425_v45 = vadd.f32 %v424_v41, %v1528_v1  ;;  %v314_v46 = vadd.f32 %v313_v42, %v1531_v2  ;;  %v426_v47 = vpop.f32.mrb[31].mxu1  ;;  %v1614_v1 = vrot.slane %v1519_v60, %v88_v43 }
 0x11d   :  { %v1288_v48 = vpack.c.bf16 %v423_v39, %v421_v33  ;;  %v427_v49 = vadd.f32 %v426_v47, %v1534_v3 }
 0x11e   :  { %1095 = vst [vmem:[#allocation2 + $0x1c0] sm:$0xff] %v1287_v44  ;;  %v1291_v51 = vpack.c.bf16 %v314_v46, %v312_v40 }
 0x11f   :  { %1096 = vst [vmem:[#allocation2 + $0x1c8] sm:$0xff] %v1288_v48  ;;  %v1292_v58 = vpack.c.bf16 %v427_v49, %v425_v45 }
 0x120   :  { %1099 = vst [vmem:[#allocation2 + $0x1e0] sm:$0xff] %v1291_v51  ;;  %v463_v2 = vpop.f32.mrb[32].mxu0 }
 0x121   :  { %1100 = vst [vmem:[#allocation2 + $0x1e8] sm:$0xff] %v1292_v58  ;;  %v464_v3 = vadd.f32 %v463_v2, %v1605_v50  ;;  %v576_v53 = vpop.f32.mrb[32].mxu1  ;;  %v465_v54 = vpop.f32.mrb[33].mxu0 }
 0x122   :  { %v577_v55 = vadd.f32 %v576_v53, %v1608_v0  ;;  %v466_v56 = vadd.f32 %v465_v54, %v1611_v52  ;;  %v578_v57 = vpop.f32.mrb[33].mxu1  ;;  %v467_v59 = vpop.f32.mrb[34].mxu0 }
 0x123   :  { %v579_v61 = vadd.f32 %v578_v57, %v1614_v1  ;;  %v468_v62 = vadd.f32 %v467_v59, %v1605_v50  ;;  %v580_v63 = vpop.f32.mrb[34].mxu1  ;;  %v469_v60 = vpop.f32.mrb[35].mxu0 }
 0x124   :  { %v1233_v4 = vpack.c.bf16 %v466_v56, %v464_v3  ;;  %v581_v5 = vadd.f32 %v580_v63, %v1608_v0  ;;  %v470_v6 = vadd.f32 %v469_v60, %v1611_v52  ;;  %v582_v7 = vpop.f32.mrb[35].mxu1 }
 0x125   :  { %v1234_v8 = vpack.c.bf16 %v579_v61, %v577_v55  ;;  %v583_v9 = vadd.f32 %v582_v7, %v1614_v1 }
 0x126   :  { %1041 = vst [vmem:[#allocation2 + $0x10] sm:$0xff] %v1233_v4  ;;  %v1237_v10 = vpack.c.bf16 %v470_v6, %v468_v62 }
 0x127   :  { %1042 = vst [vmem:[#allocation2 + $0x18] sm:$0xff] %v1234_v8  ;;  %v1238_v11 = vpack.c.bf16 %v583_v9, %v581_v5 }
 0x128   :  { %1045 = vst [vmem:[#allocation2 + $0x30] sm:$0xff] %v1237_v10  ;;  %v473_v12 = vpop.f32.mrb[36].mxu0 }
 0x129   :  { %1046 = vst [vmem:[#allocation2 + $0x38] sm:$0xff] %v1238_v11  ;;  %v474_v13 = vadd.f32 %v473_v12, %v1605_v50  ;;  %v586_v14 = vpop.f32.mrb[36].mxu1  ;;  %v475_v15 = vpop.f32.mrb[37].mxu0 }
 0x12a   :  { %v587_v16 = vadd.f32 %v586_v14, %v1608_v0  ;;  %v476_v17 = vadd.f32 %v475_v15, %v1611_v52  ;;  %v588_v18 = vpop.f32.mrb[37].mxu1  ;;  %v477_v19 = vpop.f32.mrb[38].mxu0 }
 0x12b   :  { %v589_v20 = vadd.f32 %v588_v18, %v1614_v1  ;;  %v478_v21 = vadd.f32 %v477_v19, %v1605_v50  ;;  %v590_v22 = vpop.f32.mrb[38].mxu1  ;;  %v479_v23 = vpop.f32.mrb[39].mxu0 }
 0x12c   :  { %v1241_v24 = vpack.c.bf16 %v476_v17, %v474_v13  ;;  %v591_v25 = vadd.f32 %v590_v22, %v1608_v0  ;;  %v480_v26 = vadd.f32 %v479_v23, %v1611_v52  ;;  %v592_v27 = vpop.f32.mrb[39].mxu1 }
 0x12d   :  { %v1242_v28 = vpack.c.bf16 %v589_v20, %v587_v16  ;;  %v593_v29 = vadd.f32 %v592_v27, %v1614_v1 }
 0x12e   :  { %1049 = vst [vmem:[#allocation2 + $0x50] sm:$0xff] %v1241_v24  ;;  %v1245_v30 = vpack.c.bf16 %v480_v26, %v478_v21 }
 0x12f   :  { %1050 = vst [vmem:[#allocation2 + $0x58] sm:$0xff] %v1242_v28  ;;  %v1246_v31 = vpack.c.bf16 %v593_v29, %v591_v25 }
 0x130   :  { %1053 = vst [vmem:[#allocation2 + $0x70] sm:$0xff] %v1245_v30  ;;  %v483_v32 = vpop.f32.mrb[40].mxu0 }
 0x131   :  { %1054 = vst [vmem:[#allocation2 + $0x78] sm:$0xff] %v1246_v31  ;;  %v484_v33 = vadd.f32 %v483_v32, %v1605_v50  ;;  %v596_v34 = vpop.f32.mrb[40].mxu1  ;;  %v485_v35 = vpop.f32.mrb[41].mxu0 }
 0x132   :  { %v597_v36 = vadd.f32 %v596_v34, %v1608_v0  ;;  %v486_v37 = vadd.f32 %v485_v35, %v1611_v52  ;;  %v598_v38 = vpop.f32.mrb[41].mxu1  ;;  %v487_v39 = vpop.f32.mrb[42].mxu0 }
 0x133   :  { %v599_v40 = vadd.f32 %v598_v38, %v1614_v1  ;;  %v488_v41 = vadd.f32 %v487_v39, %v1605_v50  ;;  %v600_v42 = vpop.f32.mrb[42].mxu1  ;;  %v489_v43 = vpop.f32.mrb[43].mxu0 }
 0x134   :  { %v1249_v44 = vpack.c.bf16 %v486_v37, %v484_v33  ;;  %v601_v45 = vadd.f32 %v600_v42, %v1608_v0  ;;  %v490_v46 = vadd.f32 %v489_v43, %v1611_v52  ;;  %v602_v47 = vpop.f32.mrb[43].mxu1 }
 0x135   :  { %v1250_v48 = vpack.c.bf16 %v599_v40, %v597_v36  ;;  %v603_v49 = vadd.f32 %v602_v47, %v1614_v1 }
 0x136   :  { %1057 = vst [vmem:[#allocation2 + $0x90] sm:$0xff] %v1249_v44  ;;  %v1253_v51 = vpack.c.bf16 %v490_v46, %v488_v41 }
 0x137   :  { %1058 = vst [vmem:[#allocation2 + $0x98] sm:$0xff] %v1250_v48  ;;  %v1254_v58 = vpack.c.bf16 %v603_v49, %v601_v45 }
 0x138   :  { %1061 = vst [vmem:[#allocation2 + $0xb0] sm:$0xff] %v1253_v51  ;;  %v493_v2 = vpop.f32.mrb[44].mxu0 }
 0x139   :  { %1062 = vst [vmem:[#allocation2 + $0xb8] sm:$0xff] %v1254_v58  ;;  %v494_v3 = vadd.f32 %v493_v2, %v1605_v50  ;;  %v606_v53 = vpop.f32.mrb[44].mxu1  ;;  %v495_v54 = vpop.f32.mrb[45].mxu0 }
 0x13a   :  { %v607_v55 = vadd.f32 %v606_v53, %v1608_v0  ;;  %v496_v56 = vadd.f32 %v495_v54, %v1611_v52  ;;  %v608_v57 = vpop.f32.mrb[45].mxu1  ;;  %v497_v59 = vpop.f32.mrb[46].mxu0 }
 0x13b   :  { %v609_v61 = vadd.f32 %v608_v57, %v1614_v1  ;;  %v498_v62 = vadd.f32 %v497_v59, %v1605_v50  ;;  %v610_v63 = vpop.f32.mrb[46].mxu1  ;;  %v499_v60 = vpop.f32.mrb[47].mxu0 }
 0x13c   :  { %v1257_v4 = vpack.c.bf16 %v496_v56, %v494_v3  ;;  %v611_v5 = vadd.f32 %v610_v63, %v1608_v0  ;;  %v500_v6 = vadd.f32 %v499_v60, %v1611_v52  ;;  %v612_v7 = vpop.f32.mrb[47].mxu1 }
 0x13d   :  { %v1258_v8 = vpack.c.bf16 %v609_v61, %v607_v55  ;;  %v613_v9 = vadd.f32 %v612_v7, %v1614_v1 }
 0x13e   :  { %1065 = vst [vmem:[#allocation2 + $0xd0] sm:$0xff] %v1257_v4  ;;  %v1261_v10 = vpack.c.bf16 %v500_v6, %v498_v62 }
 0x13f   :  { %1066 = vst [vmem:[#allocation2 + $0xd8] sm:$0xff] %v1258_v8  ;;  %v1262_v11 = vpack.c.bf16 %v613_v9, %v611_v5 }
 0x140   :  { %1069 = vst [vmem:[#allocation2 + $0xf0] sm:$0xff] %v1261_v10  ;;  %v503_v12 = vpop.f32.mrb[48].mxu0 }
 0x141   :  { %1070 = vst [vmem:[#allocation2 + $0xf8] sm:$0xff] %v1262_v11  ;;  %v504_v13 = vadd.f32 %v503_v12, %v1605_v50  ;;  %v616_v14 = vpop.f32.mrb[48].mxu1  ;;  %v505_v15 = vpop.f32.mrb[49].mxu0 }
 0x142   :  { %v617_v16 = vadd.f32 %v616_v14, %v1608_v0  ;;  %v506_v17 = vadd.f32 %v505_v15, %v1611_v52  ;;  %v618_v18 = vpop.f32.mrb[49].mxu1  ;;  %v507_v19 = vpop.f32.mrb[50].mxu0 }
 0x143   :  { %v619_v20 = vadd.f32 %v618_v18, %v1614_v1  ;;  %v508_v21 = vadd.f32 %v507_v19, %v1605_v50  ;;  %v620_v22 = vpop.f32.mrb[50].mxu1  ;;  %v509_v23 = vpop.f32.mrb[51].mxu0 }
 0x144   :  { %v1265_v24 = vpack.c.bf16 %v506_v17, %v504_v13  ;;  %v621_v25 = vadd.f32 %v620_v22, %v1608_v0  ;;  %v510_v26 = vadd.f32 %v509_v23, %v1611_v52  ;;  %v622_v27 = vpop.f32.mrb[51].mxu1 }
 0x145   :  { %v1266_v28 = vpack.c.bf16 %v619_v20, %v617_v16  ;;  %v623_v29 = vadd.f32 %v622_v27, %v1614_v1 }
 0x146   :  { %1073 = vst [vmem:[#allocation2 + $0x110] sm:$0xff] %v1265_v24  ;;  %v1269_v30 = vpack.c.bf16 %v510_v26, %v508_v21 }
 0x147   :  { %1074 = vst [vmem:[#allocation2 + $0x118] sm:$0xff] %v1266_v28  ;;  %v1270_v31 = vpack.c.bf16 %v623_v29, %v621_v25 }
 0x148   :  { %1077 = vst [vmem:[#allocation2 + $0x130] sm:$0xff] %v1269_v30  ;;  %v513_v32 = vpop.f32.mrb[52].mxu0 }
 0x149   :  { %1078 = vst [vmem:[#allocation2 + $0x138] sm:$0xff] %v1270_v31  ;;  %v514_v33 = vadd.f32 %v513_v32, %v1605_v50  ;;  %v626_v34 = vpop.f32.mrb[52].mxu1  ;;  %v515_v35 = vpop.f32.mrb[53].mxu0 }
 0x14a   :  { %v627_v36 = vadd.f32 %v626_v34, %v1608_v0  ;;  %v516_v37 = vadd.f32 %v515_v35, %v1611_v52  ;;  %v628_v38 = vpop.f32.mrb[53].mxu1  ;;  %v517_v39 = vpop.f32.mrb[54].mxu0 }
 0x14b   :  { %v629_v40 = vadd.f32 %v628_v38, %v1614_v1  ;;  %v518_v41 = vadd.f32 %v517_v39, %v1605_v50  ;;  %v630_v42 = vpop.f32.mrb[54].mxu1  ;;  %v519_v43 = vpop.f32.mrb[55].mxu0 }
 0x14c   :  { %v1273_v44 = vpack.c.bf16 %v516_v37, %v514_v33  ;;  %v631_v45 = vadd.f32 %v630_v42, %v1608_v0  ;;  %v520_v46 = vadd.f32 %v519_v43, %v1611_v52  ;;  %v632_v47 = vpop.f32.mrb[55].mxu1 }
 0x14d   :  { %v1274_v48 = vpack.c.bf16 %v629_v40, %v627_v36  ;;  %v633_v49 = vadd.f32 %v632_v47, %v1614_v1 }
 0x14e   :  { %1081 = vst [vmem:[#allocation2 + $0x150] sm:$0xff] %v1273_v44  ;;  %v1277_v51 = vpack.c.bf16 %v520_v46, %v518_v41 }
 0x14f   :  { %1082 = vst [vmem:[#allocation2 + $0x158] sm:$0xff] %v1274_v48  ;;  %v1278_v58 = vpack.c.bf16 %v633_v49, %v631_v45 }
 0x150   :  { %1085 = vst [vmem:[#allocation2 + $0x170] sm:$0xff] %v1277_v51  ;;  %v523_v2 = vpop.f32.mrb[56].mxu0 }
 0x151   :  { %1086 = vst [vmem:[#allocation2 + $0x178] sm:$0xff] %v1278_v58  ;;  %v524_v3 = vadd.f32 %v523_v2, %v1605_v50  ;;  %v636_v53 = vpop.f32.mrb[56].mxu1  ;;  %v525_v54 = vpop.f32.mrb[57].mxu0 }
 0x152   :  { %v637_v55 = vadd.f32 %v636_v53, %v1608_v0  ;;  %v526_v56 = vadd.f32 %v525_v54, %v1611_v52  ;;  %v638_v57 = vpop.f32.mrb[57].mxu1  ;;  %v527_v59 = vpop.f32.mrb[58].mxu0 }
 0x153   :  { %v639_v61 = vadd.f32 %v638_v57, %v1614_v1  ;;  %v528_v62 = vadd.f32 %v527_v59, %v1605_v50  ;;  %v640_v63 = vpop.f32.mrb[58].mxu1  ;;  %v529_v60 = vpop.f32.mrb[59].mxu0 }
 0x154   :  { %v1281_v4 = vpack.c.bf16 %v526_v56, %v524_v3  ;;  %v641_v5 = vadd.f32 %v640_v63, %v1608_v0  ;;  %v530_v6 = vadd.f32 %v529_v60, %v1611_v52  ;;  %v642_v7 = vpop.f32.mrb[59].mxu1 }
 0x155   :  { %v1282_v8 = vpack.c.bf16 %v639_v61, %v637_v55  ;;  %v643_v9 = vadd.f32 %v642_v7, %v1614_v1 }
 0x156   :  { %1089 = vst [vmem:[#allocation2 + $0x190] sm:$0xff] %v1281_v4  ;;  %v1285_v10 = vpack.c.bf16 %v530_v6, %v528_v62 }
 0x157   :  { %1090 = vst [vmem:[#allocation2 + $0x198] sm:$0xff] %v1282_v8  ;;  %v1286_v11 = vpack.c.bf16 %v643_v9, %v641_v5 }
 0x158   :  { %1093 = vst [vmem:[#allocation2 + $0x1b0] sm:$0xff] %v1285_v10  ;;  %v533_v12 = vpop.f32.mrb[60].mxu0 }
 0x159   :  { %1094 = vst [vmem:[#allocation2 + $0x1b8] sm:$0xff] %v1286_v11  ;;  %v534_v13 = vadd.f32 %v533_v12, %v1605_v50  ;;  %v646_v14 = vpop.f32.mrb[60].mxu1  ;;  %v535_v15 = vpop.f32.mrb[61].mxu0 }
 0x15a   :  { %v647_v16 = vadd.f32 %v646_v14, %v1608_v0  ;;  %v536_v17 = vadd.f32 %v535_v15, %v1611_v52  ;;  %v648_v18 = vpop.f32.mrb[61].mxu1  ;;  %v537_v19 = vpop.f32.mrb[62].mxu0 }
 0x15b   :  { %v649_v20 = vadd.f32 %v648_v18, %v1614_v1  ;;  %v538_v21 = vadd.f32 %v537_v19, %v1605_v50  ;;  %v650_v22 = vpop.f32.mrb[62].mxu1  ;;  %v539_v23 = vpop.f32.mrb[63].mxu0 }
 0x15c   :  { %v1289_v24 = vpack.c.bf16 %v536_v17, %v534_v13  ;;  %v651_v25 = vadd.f32 %v650_v22, %v1608_v0  ;;  %v540_v26 = vadd.f32 %v539_v23, %v1611_v52  ;;  %v652_v27 = vpop.f32.mrb[63].mxu1 }
 0x15d   :  { %v1290_v28 = vpack.c.bf16 %v649_v20, %v647_v16  ;;  %v653_v29 = vadd.f32 %v652_v27, %v1614_v1 }
 0x15e   :  { %1097 = vst [vmem:[#allocation2 + $0x1d0] sm:$0xff] %v1289_v24  ;;  %v1293_v30 = vpack.c.bf16 %v540_v26, %v538_v21 }
 0x15f   :  { %1098 = vst [vmem:[#allocation2 + $0x1d8] sm:$0xff] %v1290_v28  ;;  %v1294_v31 = vpack.c.bf16 %v653_v29, %v651_v25 }
 0x160   :  { %1101 = vst [vmem:[#allocation2 + $0x1f0] sm:$0xff] %v1293_v30 }
 0x161   :  { %1102 = vst [vmem:[#allocation2 + $0x1f8] sm:$0xff] %v1294_v31 }
 0x162   :  { %1310 = shalt.err (!%p1307_p4)
}
 0x163   :  { %s1311_s25 = scalar_lea.hbm %s1695_s3, 8192 }
 0x164   :  { %p1312_p5 = scmp.ne.s32.totalorder %s1695_s3, %s1311_s25  ;;  %p1315_p6 = scmp.lt.u32.totalorder %s1311_s25, %s1695_s3 }
 0x166   :  { %p1317_p7 = pnand %p1315_p6, %p1312_p5 }
 0x168   :  { %1320 = shalt.err (!%p1317_p7)
}
 0x169   :  { %s1325_s30 = smov 512   ;;  %s1326_s4 = smov 32  }
 0x16a   :  { %1114 = dma.vmem_to_hbm [thread:$0]  %s1109_s22, 8192, %s1695_s3, [#allocation3], %s1325_s30, %s1325_s30, %s1326_s4  }
 0x16b   :  { %1321 = dma.done.wait [#allocation3], 8192  }
 0x16c   :  { %1322 = vsyncadd [#allocation3], 4294959104 }
 0x16d   :  { %1118 = vsyncpa [#allocation3], 1 }

</bundles_post_ra>
